<compile_context>
chip_gen: v7x
topology: tpu7x:2x2x1
jax: 0.10.0
libtpu: 0.0.40
codegen_flags: <defaults>
</compile_context>

<pallas_src>
import functools

import jax
import jax.numpy as jnp
from jax import lax
from jax.experimental import pallas as pl
from jax.experimental.pallas import tpu as pltpu

BN_EPS = 1e-5
RRELU_SLOPE = (1.0 / 8.0 + 1.0 / 3.0) / 2.0  # eval-mode RReLU slope

# ---- Packed-slab layout ------------------------------------------------------
# Weight slab W: (6, H, H); unused rows/cols are zero-padded.
W_EW0, W_EW1, W_EHEAD, W_DW0, W_DW1, W_DHEAD = range(6)
# Vector slab V: (VROWS, H); one (padded) bias / gamma / beta vector per row.
(V_EB0, V_EG0, V_EBT0, V_EB1, V_EG1, V_EBT1, V_EHB,
 V_DB0, V_DG0, V_DBT0, V_DB1, V_DG1, V_DBT1, V_DHB) = range(14)
VROWS = 16          # 14 rows padded up to a sublane multiple
DATA_W = 128        # lane-dense input slab width
OUT_W = 128         # lane-dense output slab width
# Data slab (B, 128) windows (one concatenate in the wrapper):
#   [0,   H): encoder input  [x | y | 0...]
#   [H,  2H): eps window     [0_latent | eps | 0...]        (aligned with var cols)
#   [2H, 3H): decoder-y win  [0_{2*latent} | y | 0...]      (aligned past mu/eps cols)


def cvae_kernel(data_ref, w_ref, v_ref, out_ref, *, latent, H):
    data = data_ref[...]                        # (B, 128) — one block load
    B = data.shape[0]

    enc_in = data[:, 0:H]                       # [x | y | 0...]
    eps_w = data[:, H:2 * H]                    # eps at cols [latent, 2*latent)
    dec_y = data[:, 2 * H:3 * H]                # y   at cols [2*latent, 2*latent+input_dim)

    v = v_ref[...]                              # load the whole vector slab once

    def vrow(i):                                # (1, H) static register row slice
        return v[i:i + 1, :]

    def bn_rrelu(h, gamma_row, beta_row):
        # Train-mode BatchNorm1d: one-pass batch mean / biased variance (clamped),
        # gamma*rsqrt folded into one per-feature scale; then eval-mode RReLU.
        mean = jnp.mean(h, axis=0, keepdims=True)
        var = jnp.maximum(jnp.mean(h * h, axis=0, keepdims=True) - mean * mean, 0.0)
        scale = vrow(gamma_row) * lax.rsqrt(var + BN_EPS)
        shift = vrow(beta_row) - mean * scale
        hn = h * scale + shift
        return jnp.maximum(hn, hn * RRELU_SLOPE)   # slope in (0,1) => max == RReLU

    # ---- Encoder: Linear(cat(x,y)) -> BN -> RReLU -> Linear -> BN -> RReLU ----
    h = jnp.dot(enc_in, w_ref[W_EW0], preferred_element_type=jnp.float32) + vrow(V_EB0)
    h = bn_rrelu(h, V_EG0, V_EBT0)
    h = jnp.dot(h, w_ref[W_EW1], preferred_element_type=jnp.float32) + vrow(V_EB1)
    h = bn_rrelu(h, V_EG1, V_EBT1)

    # Fused mu/var head: cols [0, latent) = mu, [latent, 2*latent) = var,
    # cols >= 2*latent are exactly 0 (zero weight cols + zero bias).
    head = jnp.dot(h, w_ref[W_EHEAD], preferred_element_type=jnp.float32) + vrow(V_EHB)

    # ---- Decoder input assembled in registers, zero lane movement ----
    #   cols [0, latent)                   = z_mu
    #   cols [latent, 2*latent)            = eps * exp(z_var / 2)
    #   cols [2*latent, 2*latent+input_dim) = y
    # W_DW0 rows are packed to match (x_sample weights duplicated), so
    # d_in @ W_DW0 == [x_sample | y] @ d_w0 exactly.
    lane = lax.broadcasted_iota(jnp.int32, (B, H), 1)
    d_in = (jnp.where(lane < latent, head, 0.0)
            + eps_w * jnp.exp(head * 0.5)
            + dec_y)

    # ---- Decoder: Linear -> BN -> RReLU -> Linear -> BN -> RReLU -> head ----
    d = jnp.dot(d_in, w_ref[W_DW0], preferred_element_type=jnp.float32) + vrow(V_DB0)
    d = bn_rrelu(d, V_DG0, V_DBT0)
    d = jnp.dot(d, w_ref[W_DW1], preferred_element_type=jnp.float32) + vrow(V_DB1)
    d = bn_rrelu(d, V_DG1, V_DBT1)

    # (H -> 1) head as VPU multiply + lane reduction (avoids an N=1 MXU matmul).
    w_head = w_ref[W_DHEAD][0:1, :]             # head weight stored transposed in row 0
    logit = jnp.sum(d * w_head, axis=-1, keepdims=True) + v[V_DHB:V_DHB + 1, 0:1]
    dec = jax.nn.sigmoid(logit)

    # ---- Single masked store of the first H lanes: [mu | var | dec | ...] ----
    # Output lanes >= H are left unwritten (stale/undefined) — wrapper never reads them.
    out_ref[:, 0:H] = jnp.where(lane == 2 * latent, dec, head)


def init_params(key, input_dim, latent, hidden):
    """PyTorch-default Linear init (U(-1/sqrt(fan_in), 1/sqrt(fan_in))), BN gamma=1 /
    beta=0, packed into one weight slab W:(6,H,H) and one vector slab V:(VROWS,H)."""
    h0, h1 = hidden
    assert h0 == h1, "packed slab layout assumes equal hidden widths"
    H = h0
    assert H % 8 == 0
    assert input_dim + 1 <= H and 2 * latent + input_dim <= H and 2 * latent + 1 <= H

    def linear(k, fan_in, fan_out):
        kw, kb = jax.random.split(k)
        bound = 1.0 / float(fan_in) ** 0.5
        w = jax.random.uniform(kw, (fan_in, fan_out), jnp.float32, -bound, bound)
        b = jax.random.uniform(kb, (fan_out,), jnp.float32, -bound, bound)
        return w, b

    keys = jax.random.split(key, 7)
    e_w0, e_b0 = linear(keys[0], input_dim + 1, H)        # Encoder hidden_0
    e_w1, e_b1 = linear(keys[1], H, H)                    # Encoder hidden_1
    e_mw, e_mb = linear(keys[2], H, latent)               # Encoder mu head
    e_vw, e_vb = linear(keys[3], H, latent)               # Encoder var head
    d_w0, d_b0 = linear(keys[4], latent + input_dim, H)   # Decoder hidden_0
    d_w1, d_b1 = linear(keys[5], H, H)                    # Decoder hidden_1
    d_mw, d_mb = linear(keys[6], H, 1)                    # Decoder output head

    ones = jnp.ones((H,), jnp.float32)

    W = jnp.zeros((6, H, H), jnp.float32)
    W = W.at[W_EW0, :input_dim + 1, :].set(e_w0)
    W = W.at[W_EW1].set(e_w1)
    W = W.at[W_EHEAD, :, :latent].set(e_mw)
    W = W.at[W_EHEAD, :, latent:2 * latent].set(e_vw)
    # Decoder hidden_0, row-packed for the register-assembled decoder input:
    #   rows [0, latent)                    multiply z_mu
    #   rows [latent, 2*latent)             multiply eps*exp(var/2)   (same weights)
    #   rows [2*latent, 2*latent+input_dim) multiply y
    W = W.at[W_DW0, :latent, :].set(d_w0[:latent])
    W = W.at[W_DW0, latent:2 * latent, :].set(d_w0[:latent])
    W = W.at[W_DW0, 2 * latent:2 * latent + input_dim, :].set(d_w0[latent:latent + input_dim])
    W = W.at[W_DW1].set(d_w1)
    W = W.at[W_DHEAD, 0, :].set(d_mw[:, 0])               # stored transposed, as a row

    V = jnp.zeros((VROWS, H), jnp.float32)
    V = V.at[V_EB0].set(e_b0)
    V = V.at[V_EG0].set(ones)
    V = V.at[V_EB1].set(e_b1)
    V = V.at[V_EG1].set(ones)
    V = V.at[V_EHB, :latent].set(e_mb)
    V = V.at[V_EHB, latent:2 * latent].set(e_vb)
    V = V.at[V_DB0].set(d_b0)
    V = V.at[V_DG0].set(ones)
    V = V.at[V_DB1].set(d_b1)
    V = V.at[V_DG1].set(ones)
    V = V.at[V_DHB, 0].set(d_mb[0])
    return W, V


@jax.jit
def cvae_forward(x, y, eps, W, V):
    B = x.shape[0]
    input_dim = y.shape[1]
    latent = eps.shape[1]
    H = W.shape[-1]
    assert 3 * H <= DATA_W and 2 * latent + input_dim <= H and 2 * latent + 1 <= H

    # Single concatenate builds the lane-dense input slab (one XLA fusion, one DMA).
    def z(n):
        return jnp.zeros((B, n), jnp.float32)
    parts = [x, y, z(H - 1 - input_dim),                         # encoder window
             z(latent), eps, z(H - 2 * latent),                  # eps window
             z(2 * latent), y, z(H - 2 * latent - input_dim),    # decoder-y window
             z(DATA_W - 3 * H)]
    data = jnp.concatenate([p for p in parts if p.shape[1] > 0], axis=1)

    kernel = functools.partial(cvae_kernel, latent=latent, H=H)
    vmem = pl.BlockSpec(memory_space=pltpu.MemorySpace.VMEM)

    flops = 2 * B * H * H * 5 + 2 * B * H + 20 * B * H           # 5 matmuls + head + BN/act
    transcendentals = B * (H + 1) + 4 * H                        # exp, sigmoid, rsqrt
    bytes_accessed = 4 * (B * DATA_W + W.size + V.size + B * OUT_W)

    out = pl.pallas_call(
        kernel,
        out_shape=jax.ShapeDtypeStruct((B, OUT_W), jnp.float32),
        in_specs=[vmem, vmem, vmem],
        out_specs=vmem,
        cost_estimate=pl.CostEstimate(flops=flops,
                                      transcendentals=transcendentals,
                                      bytes_accessed=bytes_accessed),
    )(data, W, V)

    # Only columns [0, 2*latent+1) are defined; the rest of the slab is never read.
    z_mu = out[:, 0:latent]
    z_var = out[:, latent:2 * latent]
    dec_out = out[:, 2 * latent:2 * latent + 1]
    return dec_out, z_mu, z_var


def cvae_reference(x, y, eps, W, V):
    """Pure-JAX (XLA) reference with identical semantics, for a sanity check."""
    input_dim = y.shape[1]
    latent = eps.shape[1]

    def bn(h, g, b):
        mean = jnp.mean(h, axis=0, keepdims=True)
        var = jnp.mean((h - mean) ** 2, axis=0, keepdims=True)
        return (h - mean) / jnp.sqrt(var + BN_EPS) * g + b

    def rrelu(h):
        return jnp.maximum(h, h * RRELU_SLOPE)

    xy = jnp.concatenate([x, y], axis=1)
    h = xy @ W[W_EW0, :input_dim + 1, :] + V[V_EB0]
    h = rrelu(bn(h, V[V_EG0], V[V_EBT0]))
    h = h @ W[W_EW1] + V[V_EB1]
    h = rrelu(bn(h, V[V_EG1], V[V_EBT1]))
    z_mu = h @ W[W_EHEAD, :, :latent] + V[V_EHB, :latent]
    z_var = h @ W[W_EHEAD, :, latent:2 * latent] + V[V_EHB, latent:2 * latent]

    x_sample = eps * jnp.exp(z_var / 2.0) + z_mu
    d = (x_sample @ W[W_DW0, :latent, :]
         + y @ W[W_DW0, 2 * latent:2 * latent + input_dim, :] + V[V_DB0])
    d = rrelu(bn(d, V[V_DG0], V[V_DBT0]))
    d = d @ W[W_DW1] + V[V_DB1]
    d = rrelu(bn(d, V[V_DG1], V[V_DBT1]))
    logit = d @ W[W_DHEAD, 0, :][:, None] + V[V_DHB, 0]
    return jax.nn.sigmoid(logit), z_mu, z_var


if __name__ == "__main__":
    B = 8              # batch (multiple of 8 sublanes)
    INPUT_DIM = 8      # params['inputDim'] -> dim of y; x has dim 1
    LATENT = 4         # params['outputDim']
    HIDDEN = (32, 32)  # params['hiddenDim']

    key = jax.random.PRNGKey(0)
    kx, ky, keps, kparams = jax.random.split(key, 4)
    x = jax.random.normal(kx, (B, 1), jnp.float32)
    y = jax.random.normal(ky, (B, INPUT_DIM), jnp.float32)
    eps = jax.random.normal(keps, (B, LATENT), jnp.float32)  # torch.randn_like(std)

    W, V = init_params(kparams, INPUT_DIM, LATENT, HIDDEN)

    dec_out, z_mu, z_var = cvae_forward(x, y, eps, W, V)
    jax.block_until_ready((dec_out, z_mu, z_var))

    assert dec_out.shape == (B, 1)
    assert z_mu.shape == (B, LATENT)
    assert z_var.shape == (B, LATENT)
    assert bool(jnp.all(jnp.isfinite(dec_out)))
    assert bool(jnp.all((dec_out >= 0.0) & (dec_out <= 1.0)))

    # Loose-tolerance sanity check vs an XLA reference (tolerance accommodates
    # MXU vs XLA f32-matmul precision differences; catches wiring/layout bugs).
    ref_dec, ref_mu, ref_var = cvae_reference(x, y, eps, W, V)
    assert bool(jnp.allclose(dec_out, ref_dec, rtol=5e-2, atol=5e-2))
    assert bool(jnp.allclose(z_mu, ref_mu, rtol=5e-2, atol=5e-2))
    assert bool(jnp.allclose(z_var, ref_var, rtol=5e-2, atol=5e-2))

    print("KERNEL_OK")
</pallas_src>

<mosaic_0001>
module attributes {stable_mosaic.version = 11 : i64} {
  func.func @cvae_kernel(%arg0: memref<8x128xf32, #tpu.memory_space<vmem>>, %arg1: memref<6x32x32xf32, #tpu.memory_space<vmem>>, %arg2: memref<16x32xf32, #tpu.memory_space<vmem>>, %arg3: memref<8x128xf32, #tpu.memory_space<vmem>>) attributes {dimension_semantics = [], scalar_prefetch = 0 : i64, scratch_operands = 0 : i64, tpu.core_type = #tpu.core_type<tc>} {
    %c0 = arith.constant 0 : index
    %c0_0 = arith.constant 0 : index
    %0 = vector.load %arg0[%c0, %c0_0] : memref<8x128xf32, #tpu.memory_space<vmem>>, vector<8x128xf32>
    %1 = vector.extract_strided_slice %0 {offsets = [0, 0], sizes = [8, 32], strides = [1, 1]} : vector<8x128xf32> to vector<8x32xf32>
    %2 = vector.extract_strided_slice %0 {offsets = [0, 32], sizes = [8, 32], strides = [1, 1]} : vector<8x128xf32> to vector<8x32xf32>
    %3 = vector.extract_strided_slice %0 {offsets = [0, 64], sizes = [8, 32], strides = [1, 1]} : vector<8x128xf32> to vector<8x32xf32>
    %c0_1 = arith.constant 0 : index
    %c0_2 = arith.constant 0 : index
    %4 = vector.load %arg2[%c0_1, %c0_2] : memref<16x32xf32, #tpu.memory_space<vmem>>, vector<16x32xf32>
    %c0_3 = arith.constant 0 : index
    %c0_4 = arith.constant 0 : index
    %c0_5 = arith.constant 0 : index
    %5 = vector.load %arg1[%c0_3, %c0_4, %c0_5] : memref<6x32x32xf32, #tpu.memory_space<vmem>>, vector<1x32x32xf32>
    %6 = vector.shape_cast %5 : vector<1x32x32xf32> to vector<32x32xf32>
    %cst = arith.constant dense<0.000000e+00> : vector<8x32xf32>
    %7 = tpu.matmul %1, %6, %cst {dimension_numbers = #tpu.dot_dimension_numbers<[1], [0], [0], [1], [0, 0, 1, 1], [], []>} : vector<8x32xf32>, vector<32x32xf32>, vector<8x32xf32> -> vector<8x32xf32>
    %8 = vector.extract_strided_slice %4 {offsets = [0, 0], sizes = [1, 32], strides = [1, 1]} : vector<16x32xf32> to vector<1x32xf32>
    %9 = vector.broadcast %8 : vector<1x32xf32> to vector<8x32xf32>
    %10 = arith.addf %7, %9 : vector<8x32xf32>
    %cst_6 = arith.constant dense<0.000000e+00> : vector<32xf32>
    %11 = vector.multi_reduction <add>, %10, %cst_6 [0] : vector<8x32xf32> to vector<32xf32>
    %12 = vector.shape_cast %11 : vector<32xf32> to vector<1x32xf32>
    %cst_7 = arith.constant 8.000000e+00 : f32
    %13 = vector.broadcast %cst_7 : f32 to vector<1x32xf32>
    %14 = arith.divf %12, %13 : vector<1x32xf32>
    %15 = arith.mulf %10, %10 : vector<8x32xf32>
    %cst_8 = arith.constant dense<0.000000e+00> : vector<32xf32>
    %16 = vector.multi_reduction <add>, %15, %cst_8 [0] : vector<8x32xf32> to vector<32xf32>
    %17 = vector.shape_cast %16 : vector<32xf32> to vector<1x32xf32>
    %cst_9 = arith.constant 8.000000e+00 : f32
    %18 = vector.broadcast %cst_9 : f32 to vector<1x32xf32>
    %19 = arith.divf %17, %18 : vector<1x32xf32>
    %20 = arith.mulf %14, %14 : vector<1x32xf32>
    %21 = arith.subf %19, %20 : vector<1x32xf32>
    %cst_10 = arith.constant 0.000000e+00 : f32
    %22 = vector.broadcast %cst_10 : f32 to vector<1x32xf32>
    %23 = arith.maximumf %21, %22 : vector<1x32xf32>
    %24 = vector.extract_strided_slice %4 {offsets = [1, 0], sizes = [1, 32], strides = [1, 1]} : vector<16x32xf32> to vector<1x32xf32>
    %cst_11 = arith.constant 9.99999974E-6 : f32
    %25 = vector.broadcast %cst_11 : f32 to vector<1x32xf32>
    %26 = arith.addf %23, %25 : vector<1x32xf32>
    %27 = math.rsqrt %26 : vector<1x32xf32>
    %28 = arith.mulf %24, %27 : vector<1x32xf32>
    %29 = vector.extract_strided_slice %4 {offsets = [2, 0], sizes = [1, 32], strides = [1, 1]} : vector<16x32xf32> to vector<1x32xf32>
    %30 = arith.mulf %14, %28 : vector<1x32xf32>
    %31 = arith.subf %29, %30 : vector<1x32xf32>
    %32 = vector.broadcast %28 : vector<1x32xf32> to vector<8x32xf32>
    %33 = arith.mulf %10, %32 : vector<8x32xf32>
    %34 = vector.broadcast %31 : vector<1x32xf32> to vector<8x32xf32>
    %35 = arith.addf %33, %34 : vector<8x32xf32>
    %cst_12 = arith.constant 0.229166672 : f32
    %36 = vector.broadcast %cst_12 : f32 to vector<8x32xf32>
    %37 = arith.mulf %35, %36 : vector<8x32xf32>
    %38 = arith.maximumf %35, %37 : vector<8x32xf32>
    %c1 = arith.constant 1 : index
    %c0_13 = arith.constant 0 : index
    %c0_14 = arith.constant 0 : index
    %39 = vector.load %arg1[%c1, %c0_13, %c0_14] : memref<6x32x32xf32, #tpu.memory_space<vmem>>, vector<1x32x32xf32>
    %40 = vector.shape_cast %39 : vector<1x32x32xf32> to vector<32x32xf32>
    %cst_15 = arith.constant dense<0.000000e+00> : vector<8x32xf32>
    %41 = tpu.matmul %38, %40, %cst_15 {dimension_numbers = #tpu.dot_dimension_numbers<[1], [0], [0], [1], [0, 0, 1, 1], [], []>} : vector<8x32xf32>, vector<32x32xf32>, vector<8x32xf32> -> vector<8x32xf32>
    %42 = vector.extract_strided_slice %4 {offsets = [3, 0], sizes = [1, 32], strides = [1, 1]} : vector<16x32xf32> to vector<1x32xf32>
    %43 = vector.broadcast %42 : vector<1x32xf32> to vector<8x32xf32>
    %44 = arith.addf %41, %43 : vector<8x32xf32>
    %cst_16 = arith.constant dense<0.000000e+00> : vector<32xf32>
    %45 = vector.multi_reduction <add>, %44, %cst_16 [0] : vector<8x32xf32> to vector<32xf32>
    %46 = vector.shape_cast %45 : vector<32xf32> to vector<1x32xf32>
    %cst_17 = arith.constant 8.000000e+00 : f32
    %47 = vector.broadcast %cst_17 : f32 to vector<1x32xf32>
    %48 = arith.divf %46, %47 : vector<1x32xf32>
    %49 = arith.mulf %44, %44 : vector<8x32xf32>
    %cst_18 = arith.constant dense<0.000000e+00> : vector<32xf32>
    %50 = vector.multi_reduction <add>, %49, %cst_18 [0] : vector<8x32xf32> to vector<32xf32>
    %51 = vector.shape_cast %50 : vector<32xf32> to vector<1x32xf32>
    %cst_19 = arith.constant 8.000000e+00 : f32
    %52 = vector.broadcast %cst_19 : f32 to vector<1x32xf32>
    %53 = arith.divf %51, %52 : vector<1x32xf32>
    %54 = arith.mulf %48, %48 : vector<1x32xf32>
    %55 = arith.subf %53, %54 : vector<1x32xf32>
    %cst_20 = arith.constant 0.000000e+00 : f32
    %56 = vector.broadcast %cst_20 : f32 to vector<1x32xf32>
    %57 = arith.maximumf %55, %56 : vector<1x32xf32>
    %58 = vector.extract_strided_slice %4 {offsets = [4, 0], sizes = [1, 32], strides = [1, 1]} : vector<16x32xf32> to vector<1x32xf32>
    %cst_21 = arith.constant 9.99999974E-6 : f32
    %59 = vector.broadcast %cst_21 : f32 to vector<1x32xf32>
    %60 = arith.addf %57, %59 : vector<1x32xf32>
    %61 = math.rsqrt %60 : vector<1x32xf32>
    %62 = arith.mulf %58, %61 : vector<1x32xf32>
    %63 = vector.extract_strided_slice %4 {offsets = [5, 0], sizes = [1, 32], strides = [1, 1]} : vector<16x32xf32> to vector<1x32xf32>
    %64 = arith.mulf %48, %62 : vector<1x32xf32>
    %65 = arith.subf %63, %64 : vector<1x32xf32>
    %66 = vector.broadcast %62 : vector<1x32xf32> to vector<8x32xf32>
    %67 = arith.mulf %44, %66 : vector<8x32xf32>
    %68 = vector.broadcast %65 : vector<1x32xf32> to vector<8x32xf32>
    %69 = arith.addf %67, %68 : vector<8x32xf32>
    %cst_22 = arith.constant 0.229166672 : f32
    %70 = vector.broadcast %cst_22 : f32 to vector<8x32xf32>
    %71 = arith.mulf %69, %70 : vector<8x32xf32>
    %72 = arith.maximumf %69, %71 : vector<8x32xf32>
    %c2 = arith.constant 2 : index
    %c0_23 = arith.constant 0 : index
    %c0_24 = arith.constant 0 : index
    %73 = vector.load %arg1[%c2, %c0_23, %c0_24] : memref<6x32x32xf32, #tpu.memory_space<vmem>>, vector<1x32x32xf32>
    %74 = vector.shape_cast %73 : vector<1x32x32xf32> to vector<32x32xf32>
    %cst_25 = arith.constant dense<0.000000e+00> : vector<8x32xf32>
    %75 = tpu.matmul %72, %74, %cst_25 {dimension_numbers = #tpu.dot_dimension_numbers<[1], [0], [0], [1], [0, 0, 1, 1], [], []>} : vector<8x32xf32>, vector<32x32xf32>, vector<8x32xf32> -> vector<8x32xf32>
    %76 = vector.extract_strided_slice %4 {offsets = [6, 0], sizes = [1, 32], strides = [1, 1]} : vector<16x32xf32> to vector<1x32xf32>
    %77 = vector.broadcast %76 : vector<1x32xf32> to vector<8x32xf32>
    %78 = arith.addf %75, %77 : vector<8x32xf32>
    %79 = tpu.iota {dimensions = array<i32: 1>} : vector<8x32xi32>
    %c4_i32 = arith.constant 4 : i32
    %80 = vector.broadcast %c4_i32 : i32 to vector<8x32xi32>
    %81 = arith.cmpi slt, %79, %80 : vector<8x32xi32>
    %cst_26 = arith.constant 0.000000e+00 : f32
    %82 = vector.broadcast %cst_26 : f32 to vector<8x32xf32>
    %83 = arith.select %81, %78, %82 : vector<8x32xi1>, vector<8x32xf32>
    %cst_27 = arith.constant 5.000000e-01 : f32
    %84 = vector.broadcast %cst_27 : f32 to vector<8x32xf32>
    %85 = arith.mulf %78, %84 : vector<8x32xf32>
    %86 = math.exp %85 : vector<8x32xf32>
    %87 = arith.mulf %2, %86 : vector<8x32xf32>
    %88 = arith.addf %83, %87 : vector<8x32xf32>
    %89 = arith.addf %88, %3 : vector<8x32xf32>
    %c3 = arith.constant 3 : index
    %c0_28 = arith.constant 0 : index
    %c0_29 = arith.constant 0 : index
    %90 = vector.load %arg1[%c3, %c0_28, %c0_29] : memref<6x32x32xf32, #tpu.memory_space<vmem>>, vector<1x32x32xf32>
    %91 = vector.shape_cast %90 : vector<1x32x32xf32> to vector<32x32xf32>
    %cst_30 = arith.constant dense<0.000000e+00> : vector<8x32xf32>
    %92 = tpu.matmul %89, %91, %cst_30 {dimension_numbers = #tpu.dot_dimension_numbers<[1], [0], [0], [1], [0, 0, 1, 1], [], []>} : vector<8x32xf32>, vector<32x32xf32>, vector<8x32xf32> -> vector<8x32xf32>
    %93 = vector.extract_strided_slice %4 {offsets = [7, 0], sizes = [1, 32], strides = [1, 1]} : vector<16x32xf32> to vector<1x32xf32>
    %94 = vector.broadcast %93 : vector<1x32xf32> to vector<8x32xf32>
    %95 = arith.addf %92, %94 : vector<8x32xf32>
    %cst_31 = arith.constant dense<0.000000e+00> : vector<32xf32>
    %96 = vector.multi_reduction <add>, %95, %cst_31 [0] : vector<8x32xf32> to vector<32xf32>
    %97 = vector.shape_cast %96 : vector<32xf32> to vector<1x32xf32>
    %cst_32 = arith.constant 8.000000e+00 : f32
    %98 = vector.broadcast %cst_32 : f32 to vector<1x32xf32>
    %99 = arith.divf %97, %98 : vector<1x32xf32>
    %100 = arith.mulf %95, %95 : vector<8x32xf32>
    %cst_33 = arith.constant dense<0.000000e+00> : vector<32xf32>
    %101 = vector.multi_reduction <add>, %100, %cst_33 [0] : vector<8x32xf32> to vector<32xf32>
    %102 = vector.shape_cast %101 : vector<32xf32> to vector<1x32xf32>
    %cst_34 = arith.constant 8.000000e+00 : f32
    %103 = vector.broadcast %cst_34 : f32 to vector<1x32xf32>
    %104 = arith.divf %102, %103 : vector<1x32xf32>
    %105 = arith.mulf %99, %99 : vector<1x32xf32>
    %106 = arith.subf %104, %105 : vector<1x32xf32>
    %cst_35 = arith.constant 0.000000e+00 : f32
    %107 = vector.broadcast %cst_35 : f32 to vector<1x32xf32>
    %108 = arith.maximumf %106, %107 : vector<1x32xf32>
    %109 = vector.extract_strided_slice %4 {offsets = [8, 0], sizes = [1, 32], strides = [1, 1]} : vector<16x32xf32> to vector<1x32xf32>
    %cst_36 = arith.constant 9.99999974E-6 : f32
    %110 = vector.broadcast %cst_36 : f32 to vector<1x32xf32>
    %111 = arith.addf %108, %110 : vector<1x32xf32>
    %112 = math.rsqrt %111 : vector<1x32xf32>
    %113 = arith.mulf %109, %112 : vector<1x32xf32>
    %114 = vector.extract_strided_slice %4 {offsets = [9, 0], sizes = [1, 32], strides = [1, 1]} : vector<16x32xf32> to vector<1x32xf32>
    %115 = arith.mulf %99, %113 : vector<1x32xf32>
    %116 = arith.subf %114, %115 : vector<1x32xf32>
    %117 = vector.broadcast %113 : vector<1x32xf32> to vector<8x32xf32>
    %118 = arith.mulf %95, %117 : vector<8x32xf32>
    %119 = vector.broadcast %116 : vector<1x32xf32> to vector<8x32xf32>
    %120 = arith.addf %118, %119 : vector<8x32xf32>
    %cst_37 = arith.constant 0.229166672 : f32
    %121 = vector.broadcast %cst_37 : f32 to vector<8x32xf32>
    %122 = arith.mulf %120, %121 : vector<8x32xf32>
    %123 = arith.maximumf %120, %122 : vector<8x32xf32>
    %c4 = arith.constant 4 : index
    %c0_38 = arith.constant 0 : index
    %c0_39 = arith.constant 0 : index
    %124 = vector.load %arg1[%c4, %c0_38, %c0_39] : memref<6x32x32xf32, #tpu.memory_space<vmem>>, vector<1x32x32xf32>
    %125 = vector.shape_cast %124 : vector<1x32x32xf32> to vector<32x32xf32>
    %cst_40 = arith.constant dense<0.000000e+00> : vector<8x32xf32>
    %126 = tpu.matmul %123, %125, %cst_40 {dimension_numbers = #tpu.dot_dimension_numbers<[1], [0], [0], [1], [0, 0, 1, 1], [], []>} : vector<8x32xf32>, vector<32x32xf32>, vector<8x32xf32> -> vector<8x32xf32>
    %127 = vector.extract_strided_slice %4 {offsets = [10, 0], sizes = [1, 32], strides = [1, 1]} : vector<16x32xf32> to vector<1x32xf32>
    %128 = vector.broadcast %127 : vector<1x32xf32> to vector<8x32xf32>
    %129 = arith.addf %126, %128 : vector<8x32xf32>
    %cst_41 = arith.constant dense<0.000000e+00> : vector<32xf32>
    %130 = vector.multi_reduction <add>, %129, %cst_41 [0] : vector<8x32xf32> to vector<32xf32>
    %131 = vector.shape_cast %130 : vector<32xf32> to vector<1x32xf32>
    %cst_42 = arith.constant 8.000000e+00 : f32
    %132 = vector.broadcast %cst_42 : f32 to vector<1x32xf32>
    %133 = arith.divf %131, %132 : vector<1x32xf32>
    %134 = arith.mulf %129, %129 : vector<8x32xf32>
    %cst_43 = arith.constant dense<0.000000e+00> : vector<32xf32>
    %135 = vector.multi_reduction <add>, %134, %cst_43 [0] : vector<8x32xf32> to vector<32xf32>
    %136 = vector.shape_cast %135 : vector<32xf32> to vector<1x32xf32>
    %cst_44 = arith.constant 8.000000e+00 : f32
    %137 = vector.broadcast %cst_44 : f32 to vector<1x32xf32>
    %138 = arith.divf %136, %137 : vector<1x32xf32>
    %139 = arith.mulf %133, %133 : vector<1x32xf32>
    %140 = arith.subf %138, %139 : vector<1x32xf32>
    %cst_45 = arith.constant 0.000000e+00 : f32
    %141 = vector.broadcast %cst_45 : f32 to vector<1x32xf32>
    %142 = arith.maximumf %140, %141 : vector<1x32xf32>
    %143 = vector.extract_strided_slice %4 {offsets = [11, 0], sizes = [1, 32], strides = [1, 1]} : vector<16x32xf32> to vector<1x32xf32>
    %cst_46 = arith.constant 9.99999974E-6 : f32
    %144 = vector.broadcast %cst_46 : f32 to vector<1x32xf32>
    %145 = arith.addf %142, %144 : vector<1x32xf32>
    %146 = math.rsqrt %145 : vector<1x32xf32>
    %147 = arith.mulf %143, %146 : vector<1x32xf32>
    %148 = vector.extract_strided_slice %4 {offsets = [12, 0], sizes = [1, 32], strides = [1, 1]} : vector<16x32xf32> to vector<1x32xf32>
    %149 = arith.mulf %133, %147 : vector<1x32xf32>
    %150 = arith.subf %148, %149 : vector<1x32xf32>
    %151 = vector.broadcast %147 : vector<1x32xf32> to vector<8x32xf32>
    %152 = arith.mulf %129, %151 : vector<8x32xf32>
    %153 = vector.broadcast %150 : vector<1x32xf32> to vector<8x32xf32>
    %154 = arith.addf %152, %153 : vector<8x32xf32>
    %cst_47 = arith.constant 0.229166672 : f32
    %155 = vector.broadcast %cst_47 : f32 to vector<8x32xf32>
    %156 = arith.mulf %154, %155 : vector<8x32xf32>
    %157 = arith.maximumf %154, %156 : vector<8x32xf32>
    %c5 = arith.constant 5 : index
    %c0_48 = arith.constant 0 : index
    %c0_49 = arith.constant 0 : index
    %158 = vector.load %arg1[%c5, %c0_48, %c0_49] : memref<6x32x32xf32, #tpu.memory_space<vmem>>, vector<1x32x32xf32>
    %159 = vector.shape_cast %158 : vector<1x32x32xf32> to vector<32x32xf32>
    %160 = vector.extract_strided_slice %159 {offsets = [0, 0], sizes = [1, 32], strides = [1, 1]} : vector<32x32xf32> to vector<1x32xf32>
    %161 = vector.broadcast %160 : vector<1x32xf32> to vector<8x32xf32>
    %162 = arith.mulf %157, %161 : vector<8x32xf32>
    %cst_50 = arith.constant dense<0.000000e+00> : vector<8xf32>
    %163 = vector.multi_reduction <add>, %162, %cst_50 [1] : vector<8x32xf32> to vector<8xf32>
    %164 = vector.shape_cast %163 : vector<8xf32> to vector<8x1xf32>
    %165 = vector.extract_strided_slice %4 {offsets = [13, 0], sizes = [1, 1], strides = [1, 1]} : vector<16x32xf32> to vector<1x1xf32>
    %166 = vector.broadcast %165 : vector<1x1xf32> to vector<8x1xf32>
    %167 = arith.addf %164, %166 : vector<8x1xf32>
    %168 = arith.negf %167 : vector<8x1xf32>
    %169 = math.exp %168 : vector<8x1xf32>
    %cst_51 = arith.constant 1.000000e+00 : f32
    %170 = vector.broadcast %cst_51 : f32 to vector<8x1xf32>
    %171 = arith.addf %170, %169 : vector<8x1xf32>
    %172 = arith.divf %170, %171 : vector<8x1xf32>
    %c8_i32 = arith.constant 8 : i32
    %173 = vector.broadcast %c8_i32 : i32 to vector<8x32xi32>
    %174 = arith.cmpi eq, %79, %173 : vector<8x32xi32>
    %175 = vector.shape_cast %172 : vector<8x1xf32> to vector<8x1xf32>
    %176 = vector.broadcast %175 : vector<8x1xf32> to vector<8x32xf32>
    %177 = arith.select %174, %176, %78 : vector<8x32xi1>, vector<8x32xf32>
    %c0_52 = arith.constant 0 : index
    %c0_53 = arith.constant 0 : index
    %178 = vector.load %arg3[%c0_52, %c0_53] : memref<8x128xf32, #tpu.memory_space<vmem>>, vector<8x32xf32>
    tpu.vector_store %arg3[%c0_52, %c0_53], %177 {strides = array<i32>} : memref<8x128xf32, #tpu.memory_space<vmem>>, vector<8x32xf32>,
    return
  }
}

</mosaic_0001>

<bundles_post_ra>
// kernel: cvae_forward.1
= control target key start
LH: loop header
LB: loop body
LE: loop exit
PB: predicated region body
PF: predicated region fallthrough
CT: control target
= control target key end

     0   :  { %8 = vsyncpa [#allocation3], 0  ;;  %s822_s12 = smov [#allocation2]   ;;  %s972_s0 = inlined_call_operand.vmem [shape: f32[8,128], index: 0, kind: input, shape index: {}]   ;;  %s973_s1 = inlined_call_operand.hbm [shape: f32[6,32,32], index: 1, kind: input, shape index: {}]   ;;  %s974_s2 = inlined_call_operand.vmem [shape: f32[16,32], index: 2, kind: input, shape index: {}]   ;;  %s975_s3 = inlined_call_operand.vmem [shape: f32[8,128], index: 3, kind: output, shape index: {}]  }
   0x1   :  { %s16_s13 = sshll.u32 %s822_s12, 4  ;;  %s798_s16 = scalar_lea.hbm %s973_s1, 3072  ;;  %s17_s13 = int_to_ptr.vmem [resolvable:$true] %s16_s13 }
   0x2   :  { %p799_p0 = scmp.ne.s32.totalorder %s973_s1, %s798_s16  ;;  %p802_p1 = scmp.lt.u32.totalorder %s798_s16, %s973_s1 }
   0x4   :  { %p804_p2 = pnand %p802_p1, %p799_p0 }
   0x6   :  { %807 = shalt.err (!%p804_p2)
}
   0x7   :  { %s808_s21 = scalar_lea.vmem %s17_s13, 3072  ;;  %p813_p4 = scmp.lt.s32.totalorder %s17_s13, %s17_s13 }
   0x8   :  { %p809_p3 = scmp.ne.s32.totalorder %s17_s13, %s808_s21  ;;  %p814_p5 = scmp.lt.s32.totalorder %s808_s21, %s808_s21 }
   0xa   :  { %p815_p6 = por %p814_p5, %p813_p4 }
   0xc   :  { %p816_p7 = pnand %p815_p6, %p809_p3 }
   0xe   :  { %819 = shalt.err (!%p816_p7)
}
   0xf   :  { %s823_s22 = smov 128   ;;  %s824_s23 = smov 8  }
  0x10   :  { %22 = dma.hbm_to_vmem [thread:$0]  %s973_s1, 3072, %s17_s13, [#allocation3], %s823_s22, %s823_s22, %s824_s23  }
  0x11   :  { %820 = dma.done.wait [#allocation3], 3072  }
  0x12   :  { %821 = vsyncadd [#allocation3], 4294964224  ;;  %v825_v0 = vmov 0.0|0.0   ;;  %vm826_vm0 = vmmov 0   ;;  %v827_v1 = vmov 0.0   ;;  %v31_v2 = vld [vmem:[#allocation2] sm:$0xff]  ;;  %v35_v15 = vlaneseq }
  0x13   :  { %743 = vmatprep.subr.bf16.mxu0 %v825_v0  ;;  %696 = vmatprep.mubr.msk.f32.mxu0 %vm826_vm0, %v827_v1  ;;  %v32_v3 = vld [vmem:[#allocation2 + $0x8] sm:$0xff]  ;;  %v33_v4 = vld [vmem:[#allocation2 + $0x10] sm:$0xff]  ;;  %v34_v6 = vld [vmem:[#allocation2 + $0x18] sm:$0xff]  ;;  %vm39_vm1 = vcmask 261120   ;;  %s828_s28 = smov 64   ;;  %s829_s29 = smov 32  }
  0x14   :  { %749 = vmatprep.subr.bf16.mxu1 %v825_v0  ;;  %707 = vmatprep.mubr.msk.f32.mxu1 %vm826_vm0, %v827_v1  ;;  %v744_v5 = vpack.c.bf16 %v32_v3, %v31_v2  ;;  %v747_v7 = vpack.c.bf16 %v34_v6, %v33_v4  ;;  %v874_v8 = vld [vmem:[%s972_s0] sm:$0xff]  ;;  %v156_v10 = vld [vmem:[#allocation2 + $0x28] sm:$0xff]  ;;  %v157_v12 = vld [vmem:[#allocation2 + $0x30] sm:$0xff]  ;;  %v884_v16 = vshrl.u32 %v35_v15, 7  ;;  %s830_s30 = smov 96  }
  0x15   :  { %v155_v9 = vld [vmem:[#allocation2 + $0x20] sm:$0xff]  ;;  %v158_v13 = vld [vmem:[#allocation2 + $0x38] sm:$0xff]  ;;  %v278_v58 = vld [vmem:[#allocation2 + $0x48] sm:$0xff]  ;;  %375 = vrot.lane.b32.xlu1 %v874_v8, %s828_s28 }
  0x16   :  { %745 = vmatpush3.bf16.msra.mxu0 %v744_v5  ;;  %v750_v11 = vpack.c.bf16 %v156_v10, %v155_v9  ;;  %v753_v14 = vpack.c.bf16 %v158_v13, %v157_v12  ;;  %v887_v17 = vsub.s32 0, %v884_v16  ;;  %v892_v18 = vld [vmem:[%s974_s2] sm:$0xff]  ;;  %v144_v46 = vsub.s32 1, %v884_v16  ;;  %v279_v60 = vld [vmem:[#allocation2 + $0x50] sm:$0xff]  ;;  %v280_v61 = vld [vmem:[#allocation2 + $0x58] sm:$0xff] }
  0x17   :  { %746 = vmatprep.subr.bf16.mxu0 %v825_v0  ;;  %v149_v50 = vsub.s32 2, %v884_v16  ;;  %v277_v57 = vld [vmem:[#allocation2 + $0x40] sm:$0xff]  ;;  %v759_v62 = vpack.c.bf16 %v280_v61, %v279_v60  ;;  %v161_v63 = vsub.s32 3, %v884_v16 }
  0x18   :  { %751 = vmatpush3.bf16.msra.mxu1 %v750_v11  ;;  %v38_v19 = vrot.slane %v892_v18, %v887_v17  ;;  %v756_v59 = vpack.c.bf16 %v278_v58, %v277_v57  ;;  %v382_v57 = vld [vmem:[#allocation2 + $0x70] sm:$0xff]  ;;  %v383_v58 = vld [vmem:[#allocation2 + $0x78] sm:$0xff] }
  0x19   :  { %752 = vmatprep.subr.bf16.mxu1 %v825_v0  ;;  %v162_v2 = vrot.slane %v892_v18, %v161_v63 }
  0x1a   :  { %748 = vmatpush3.bf16.msra.mxu0 %v747_v7 }
  0x1b   :  { %755 = vmatprep.subr.bf16.mxu0 %v825_v0 }
  0x1c   :  { %754 = vmatpush3.bf16.msra.mxu1 %v753_v14 }
  0x1d   :  { %697 = vmatmul.mubr.msk.f32.vlgmr.msra.gmra.mrb[0].mxu0 %vm39_vm1, %v874_v8  ;;  %761 = vmatprep.subr.bf16.mxu1 %v825_v0 }
  0x1e   :  { %718 = vmatprep.mubr.msk.f32.mxu0 %vm826_vm0, %v827_v1  ;;  %757 = vmatpush3.bf16.msra.mxu0 %v756_v59  ;;  %v765_v59 = vpack.c.bf16 %v383_v58, %v382_v57 }
  0x1f   :  { %758 = vmatprep.subr.bf16.mxu0 %v825_v0 }
  0x22   :  { %760 = vmatpush3.bf16.msra.mxu0 %v759_v62  ;;  %v937_v62 = vand.u32 127, %v35_v15 }
  0x23   :  { %767 = vmatprep.subr.bf16.mxu0 %v825_v0 }
  0x24   :  { %vm360_vm2 = vcmp.lt.s32.totalorder %v937_v62, 4  ;;  %vm644_vm3 = vcmp.eq.s32.totalorder %v937_v62, 8 }
  0xf0   :  { %v109_v20 = vpop.f32.mrb[0].mxu0 }
  0xf1   :  { %v110_v21 = vadd.f32 %v109_v20, %v38_v19  ;;  %v698_v22 = vpop.f32.mrb[1].mxu0 }
  0xf3   :  { %v113_v23 = vsel %vm39_vm1, %v110_v21, 0.0  ;;  %v122_v24 = vmul.f32 %v110_v21, %v110_v21 }
  0xf4   :  { %v114_v25 = vrot.slane %v113_v23, 4 }
  0xf5   :  { %v123_v26 = vsel %vm39_vm1, %v122_v24, 0.0 }
  0xf6   :  { %v115_v27 = vadd.f32 %v114_v25, %v113_v23  ;;  %v124_v28 = vrot.slane %v123_v26, 4 }
  0xf8   :  { %v116_v29 = vrot.slane %v115_v27, 2  ;;  %v125_v30 = vadd.f32 %v124_v28, %v123_v26 }
  0xfa   :  { %v117_v31 = vadd.f32 %v116_v29, %v115_v27  ;;  %v126_v32 = vrot.slane %v125_v30, 2 }
  0xfc   :  { %v118_v33 = vrot.slane %v117_v31, 1  ;;  %v127_v34 = vadd.f32 %v126_v32, %v125_v30 }
  0xfe   :  { %v119_v35 = vadd.f32 %v118_v33, %v117_v31  ;;  %v128_v36 = vrot.slane %v127_v34, 1 }
 0x100   :  { %v121_v37 = vmul.f32 0.125, %v119_v35  ;;  %v129_v38 = vadd.f32 %v128_v36, %v127_v34  ;;  %v266_v34 = vsub.s32 4, %v884_v16 }
 0x102   :  { %v130_v39 = vmul.f32 0.125, %v129_v38  ;;  %v131_v40 = vmul.f32 %v121_v37, %v121_v37  ;;  %v271_v38 = vsub.s32 5, %v884_v16 }
 0x104   :  { %v132_v41 = vsub.f32 %v130_v39, %v131_v40 }
 0x106   :  { %v133_v42 = vmax.f32 %v132_v41, 0.0 }
 0x108   :  { %v134_v43 = vadd.f32 1e-05, %v133_v42 }
 0x10a   :  { %784 = vrsqrt.f32 %v134_v43 }
 0x114   :  { %v785_v44 = vpop.eup %784 }
 0x115   :  { %v136_v45 = vmul.f32 %v785_v44, %v892_v18 }
 0x117   :  { %v137_v47 = vmul.f32 %v136_v45, %v121_v37  ;;  %v145_v49 = vrot.slane %v136_v45, %v144_v46  ;;  %v283_v45 = vsub.s32 6, %v884_v16 }
 0x119   :  { %v139_v48 = vrot.slane %v137_v47, 7  ;;  %v146_v52 = vmul.f32 %v145_v49, %v110_v21  ;;  %v284_v47 = vrot.slane %v892_v18, %v283_v45 }
 0x11b   :  { %v141_v51 = vsub.f32 %v892_v18, %v139_v48 }
 0x11d   :  { %v150_v53 = vrot.slane %v141_v51, %v149_v50 }
 0x11f   :  { %v151_v54 = vadd.f32 %v150_v53, %v146_v52 }
 0x121   :  { %v152_v55 = vmul.f32 0.22916667, %v151_v54 }
 0x123   :  { %v153_v56 = vmax.f32 %v151_v54, %v152_v55  ;;  %v380_v54 = vld [vmem:[#allocation2 + $0x60] sm:$0xff]  ;;  %v381_v55 = vld [vmem:[#allocation2 + $0x68] sm:$0xff] }
 0x125   :  { %708 = vmatmul.mubr.msk.f32.vlgmr.msra.gmra.mrb[0].mxu1 %vm39_vm1, %v153_v56  ;;  %v762_v56 = vpack.c.bf16 %v381_v55, %v380_v54 }
 0x126   :  { %729 = vmatprep.mubr.msk.f32.mxu1 %vm826_vm0, %v827_v1 }
 0x127   :  { %763 = vmatpush3.bf16.msra.mxu1 %v762_v56 }
 0x128   :  { %764 = vmatprep.subr.bf16.mxu1 %v825_v0 }
 0x12b   :  { %766 = vmatpush3.bf16.msra.mxu1 %v765_v59 }
 0x1f8   :  { %v232_v3 = vpop.f32.mrb[0].mxu1 }
 0x1f9   :  { %v233_v4 = vadd.f32 %v232_v3, %v162_v2  ;;  %v709_v5 = vpop.f32.mrb[1].mxu1 }
 0x1fb   :  { %v236_v6 = vsel %vm39_vm1, %v233_v4, 0.0  ;;  %v244_v7 = vmul.f32 %v233_v4, %v233_v4 }
 0x1fc   :  { %v237_v9 = vrot.slane %v236_v6, 4 }
 0x1fd   :  { %v245_v10 = vsel %vm39_vm1, %v244_v7, 0.0  ;;  %v502_v7 = vld [vmem:[#allocation2 + $0x80] sm:$0xff] }
 0x1fe   :  { %v238_v11 = vadd.f32 %v237_v9, %v236_v6  ;;  %v246_v12 = vrot.slane %v245_v10, 4  ;;  %v503_v9 = vld [vmem:[#allocation2 + $0x88] sm:$0xff] }
 0x200   :  { %v239_v13 = vrot.slane %v238_v11, 2  ;;  %v247_v14 = vadd.f32 %v246_v12, %v245_v10  ;;  %v768_v10 = vpack.c.bf16 %v503_v9, %v502_v7  ;;  %v386_v12 = vsub.s32 7, %v884_v16 }
 0x202   :  { %v240_v19 = vadd.f32 %v239_v13, %v238_v11  ;;  %v248_v20 = vrot.slane %v247_v14, 2  ;;  %v505_v11 = vld [vmem:[#allocation2 + $0x98] sm:$0xff]  ;;  %v387_v13 = vrot.slane %v892_v18, %v386_v12 }
 0x204   :  { %v241_v21 = vrot.slane %v240_v19, 1  ;;  %v249_v22 = vadd.f32 %v248_v20, %v247_v14 }
 0x206   :  { %v242_v23 = vadd.f32 %v241_v21, %v240_v19  ;;  %v250_v24 = vrot.slane %v249_v22, 1 }
 0x208   :  { %v243_v25 = vmul.f32 0.125, %v242_v23  ;;  %v251_v26 = vadd.f32 %v250_v24, %v249_v22 }
 0x20a   :  { %v252_v27 = vmul.f32 0.125, %v251_v26  ;;  %v253_v28 = vmul.f32 %v243_v25, %v243_v25 }
 0x20c   :  { %v254_v29 = vsub.f32 %v252_v27, %v253_v28 }
 0x20e   :  { %v255_v30 = vmax.f32 %v254_v29, 0.0 }
 0x210   :  { %v256_v31 = vadd.f32 1e-05, %v255_v30 }
 0x212   :  { %786 = vrsqrt.f32 %v256_v31 }
 0x21c   :  { %v787_v32 = vpop.eup %786 }
 0x21d   :  { %v258_v33 = vmul.f32 %v787_v32, %v892_v18 }
 0x21f   :  { %v259_v35 = vmul.f32 %v258_v33, %v243_v25  ;;  %v267_v37 = vrot.slane %v258_v33, %v266_v34 }
 0x221   :  { %v261_v36 = vrot.slane %v259_v35, 7  ;;  %v268_v40 = vmul.f32 %v267_v37, %v233_v4  ;;  %v376_v4 = vpop.permute.xlu1 %375 }
 0x223   :  { %v263_v39 = vsub.f32 %v892_v18, %v261_v36 }
 0x225   :  { %v272_v41 = vrot.slane %v263_v39, %v271_v38 }
 0x227   :  { %v273_v42 = vadd.f32 %v272_v41, %v268_v40 }
 0x229   :  { %v274_v43 = vmul.f32 0.22916667, %v273_v42 }
 0x22b   :  { %v275_v44 = vmax.f32 %v273_v42, %v274_v43  ;;  %v30_v42 = vld [vmem:[%s974_s2 + $0x8] sm:$0xff] }
 0x22d   :  { %719 = vmatmul.mubr.msk.f32.vlgmr.msra.gmra.mrb[2].mxu0 %vm39_vm1, %v275_v44 }
 0x22e   :  { %740 = vmatprep.mubr.msk.f32.mxu0 %vm826_vm0, %v827_v1  ;;  %769 = vmatpush3.bf16.msra.mxu0 %v768_v10 }
 0x22f   :  { %770 = vmatprep.subr.bf16.mxu0 %v825_v0 }
 0x300   :  { %v354_v48 = vpop.f32.mrb[2].mxu0 }
 0x301   :  { %v930_v49 = vadd.f32 %v354_v48, %v284_v47  ;;  %v720_v51 = vpop.f32.mrb[3].mxu0 }
 0x303   :  { %v362_v52 = vmul.f32 0.5, %v930_v49  ;;  %v361_v3 = vsel %vm360_vm2, %v930_v49, 0.0 }
 0x305   :  { %v363_v53 = vmul.f32 1.442695, %v362_v52 }
 0x307   :  { %788 = vpow2.f32 %v363_v53 }
 0x311   :  { %v789_v1 = vpop.eup %788 }
 0x312   :  { %366 = vrot.lane.b32.xlu0 %v789_v1, %s829_s29  ;;  %v509_v1 = vrot.slane %v30_v42, %v149_v50 }
 0x384   :  { %v367_v60 = vpop.permute.xlu0 %366 }
 0x385   :  { %v369_v61 = vmul.f32 %v367_v60, %v874_v8  ;;  %v504_v8 = vld [vmem:[#allocation2 + $0x90] sm:$0xff] }
 0x386   :  { %v771_v15 = vpack.c.bf16 %v505_v11, %v504_v8 }
 0x387   :  { %371 = vrot.lane.b32.xlu0 %v369_v61, %s830_s30 }
 0x388   :  { %772 = vmatpush3.bf16.msra.mxu0 %v771_v15 }
 0x3f9   :  { %v372_v2 = vpop.permute.xlu0 %371 }
 0x3fa   :  { %v374_v5 = vadd.f32 %v372_v2, %v361_v3 }
 0x3fc   :  { %v378_v6 = vadd.f32 %v376_v4, %v374_v5 }
 0x3fe   :  { %730 = vmatmul.mubr.msk.f32.vlgmr.msra.gmra.mrb[2].mxu1 %vm39_vm1, %v378_v6 }
 0x4d1   :  { %v457_v14 = vpop.f32.mrb[2].mxu1 }
 0x4d2   :  { %v458_v19 = vadd.f32 %v457_v14, %v387_v13  ;;  %v731_v20 = vpop.f32.mrb[3].mxu1 }
 0x4d4   :  { %v461_v21 = vsel %vm39_vm1, %v458_v19, 0.0  ;;  %v469_v22 = vmul.f32 %v458_v19, %v458_v19 }
 0x4d5   :  { %v462_v23 = vrot.slane %v461_v21, 4 }
 0x4d6   :  { %v470_v24 = vsel %vm39_vm1, %v469_v22, 0.0 }
 0x4d7   :  { %v463_v25 = vadd.f32 %v462_v23, %v461_v21  ;;  %v471_v26 = vrot.slane %v470_v24, 4 }
 0x4d9   :  { %v464_v0 = vrot.slane %v463_v25, 2  ;;  %v472_v27 = vadd.f32 %v471_v26, %v470_v24 }
 0x4db   :  { %v465_v28 = vadd.f32 %v464_v0, %v463_v25  ;;  %v473_v29 = vrot.slane %v472_v27, 2 }
 0x4dd   :  { %v466_v30 = vrot.slane %v465_v28, 1  ;;  %v474_v31 = vadd.f32 %v473_v29, %v472_v27  ;;  %v624_v29 = vld [vmem:[#allocation2 + $0xa0] sm:$0xff] }
 0x4df   :  { %v467_v32 = vadd.f32 %v466_v30, %v465_v28  ;;  %v475_v33 = vrot.slane %v474_v31, 1 }
 0x4e1   :  { %v468_v18 = vmul.f32 0.125, %v467_v32  ;;  %v476_v35 = vadd.f32 %v475_v33, %v474_v31  ;;  %v628_v32 = vrot.slane %v624_v29, %v887_v17 }
 0x4e3   :  { %v477_v36 = vmul.f32 0.125, %v476_v35  ;;  %v478_v37 = vmul.f32 %v468_v18, %v468_v18 }
 0x4e5   :  { %v479_v39 = vsub.f32 %v477_v36, %v478_v37  ;;  %v831_v36 = vmov 0  }
 0x4e6   :  { %783 = vset.pattern.permute.xlu0 %v831_v36 }
 0x4e7   :  { %v480_v40 = vmax.f32 %v479_v39, 0.0 }
 0x4e9   :  { %v481_v41 = vadd.f32 1e-05, %v480_v40 }
 0x4eb   :  { %790 = vrsqrt.f32 %v481_v41 }
 0x4f5   :  { %v791_v43 = vpop.eup %790 }
 0x4f6   :  { %v483_v44 = vmul.f32 %v791_v43, %v30_v42 }
 0x4f8   :  { %v484_v45 = vmul.f32 %v483_v44, %v468_v18  ;;  %v492_v48 = vrot.slane %v483_v44, %v887_v17 }
 0x4fa   :  { %v486_v47 = vrot.slane %v484_v45, 7  ;;  %v493_v52 = vmul.f32 %v492_v48, %v458_v19 }
 0x4fc   :  { %v488_v51 = vsub.f32 %v30_v42, %v486_v47 }
 0x4fe   :  { %v497_v53 = vrot.slane %v488_v51, %v144_v46 }
 0x500   :  { %v498_v54 = vadd.f32 %v497_v53, %v493_v52 }
 0x502   :  { %v499_v55 = vmul.f32 0.22916667, %v498_v54 }
 0x504   :  { %v500_v56 = vmax.f32 %v498_v54, %v499_v55 }
 0x506   :  { %741 = vmatmul.mubr.msk.f32.vlgmr.msra.gmra.mrb[4].mxu0 %vm39_vm1, %v500_v56 }
 0x5d9   :  { %v579_v57 = vpop.f32.mrb[4].mxu0 }
 0x5da   :  { %v580_v58 = vadd.f32 %v579_v57, %v509_v1  ;;  %v742_v59 = vpop.f32.mrb[5].mxu0 }
 0x5dc   :  { %v583_v60 = vsel %vm39_vm1, %v580_v58, 0.0  ;;  %v591_v61 = vmul.f32 %v580_v58, %v580_v58 }
 0x5dd   :  { %v584_v2 = vrot.slane %v583_v60, 4 }
 0x5de   :  { %v592_v3 = vsel %vm39_vm1, %v591_v61, 0.0 }
 0x5df   :  { %v585_v4 = vadd.f32 %v584_v2, %v583_v60  ;;  %v593_v5 = vrot.slane %v592_v3, 4 }
 0x5e1   :  { %v586_v46 = vrot.slane %v585_v4, 2  ;;  %v594_v6 = vadd.f32 %v593_v5, %v592_v3 }
 0x5e3   :  { %v587_v7 = vadd.f32 %v586_v46, %v585_v4  ;;  %v595_v9 = vrot.slane %v594_v6, 2 }
 0x5e5   :  { %v588_v10 = vrot.slane %v587_v7, 1  ;;  %v596_v8 = vadd.f32 %v595_v9, %v594_v6 }
 0x5e7   :  { %v589_v11 = vadd.f32 %v588_v10, %v587_v7  ;;  %v597_v15 = vrot.slane %v596_v8, 1 }
 0x5e9   :  { %v590_v50 = vmul.f32 0.125, %v589_v11  ;;  %v598_v12 = vadd.f32 %v597_v15, %v596_v8 }
 0x5eb   :  { %v599_v13 = vmul.f32 0.125, %v598_v12  ;;  %v600_v14 = vmul.f32 %v590_v50, %v590_v50 }
 0x5ed   :  { %v601_v19 = vsub.f32 %v599_v13, %v600_v14 }
 0x5ef   :  { %v602_v20 = vmax.f32 %v601_v19, 0.0 }
 0x5f1   :  { %v603_v21 = vadd.f32 1e-05, %v602_v20 }
 0x5f3   :  { %792 = vrsqrt.f32 %v603_v21 }
 0x5fd   :  { %v793_v22 = vpop.eup %792 }
 0x5fe   :  { %v605_v23 = vmul.f32 %v793_v22, %v30_v42 }
 0x600   :  { %v606_v24 = vmul.f32 %v605_v23, %v590_v50  ;;  %v614_v26 = vrot.slane %v605_v23, %v161_v63  ;;  %v636_v63 = vrot.slane %v30_v42, %v271_v38 }
 0x602   :  { %v608_v25 = vrot.slane %v606_v24, 7  ;;  %v615_v27 = vmul.f32 %v614_v26, %v580_v58 }
 0x604   :  { %v610_v0 = vsub.f32 %v30_v42, %v608_v25 }
 0x606   :  { %v619_v28 = vrot.slane %v610_v0, %v266_v34 }
 0x608   :  { %v620_v30 = vadd.f32 %v619_v28, %v615_v27 }
 0x60a   :  { %v621_v31 = vmul.f32 0.22916667, %v620_v30 }
 0x60c   :  { %v622_v33 = vmax.f32 %v620_v30, %v621_v31 }
 0x60e   :  { %v629_v18 = vmul.f32 %v628_v32, %v622_v33 }
 0x610   :  { %v630_v35 = vsel %vm39_vm1, %v629_v18, 0.0 }
 0x611   :  { %631 = vadd.xlane.f32.xlu1 %v630_v35 }
 0x69e   :  { %v632_v37 = vpop.xlane.xlu1 %631 }
 0x69f   :  { %v637_v39 = vadd.f32 %v636_v63, %v632_v37 }
 0x6a1   :  { %v662_v40 = vmul.f32 -1.442695, %v637_v39 }
 0x6a3   :  { %794 = vpow2.f32 %v662_v40 }
 0x6ad   :  { %v795_v34 = vpop.eup %794 }
 0x6ae   :  { %v641_v41 = vadd.f32 1.0, %v795_v34 }
 0x6b0   :  { %796 = vrcp.f32 %v641_v41 }
 0x6ba   :  { %v797_v43 = vpop.eup %796 }
 0x6bb   :  { %647 = vperm.xlu0 %783, %v797_v43  }
 0x73a   :  { %v648_v17 = vpop.permute.xlu0 %647 }
 0x73b   :  { %v650_v44 = vsel %vm644_vm3, %v648_v17, %v930_v49 }
 0x73c   :  { %651 = vst.msk [vmem:[%s975_s3] sm:$0xff] %vm39_vm1, %v650_v44 }
 0x73d   :  { %656 = vsyncpa [#allocation3], 1 }

</bundles_post_ra>
